<compile_context>
chip_gen: v5e
topology: v5e:2x2
jax: 0.10.0
libtpu: 0.0.40
codegen_flags: <defaults>
</compile_context>

<pallas_src>
import functools

import jax
import jax.numpy as jnp
from jax.experimental import pallas as pl
from jax.experimental.pallas import tpu as pltpu

_COMPUTE_DTYPE = jnp.bfloat16
_TILE_M = 512          # rows per grid step for the 1x1 / fused-tail kernels
_SUB_M = 256           # in-kernel sub-tile for the chained matmuls
_BLOCK_H_TARGET = 8    # image rows per 3x3-conv grid step
_MIB = 1024 * 1024


def _vmem_limit(estimate_bytes):
    """VMEM scoped limit: >= 32 MiB default, capped by the chip's capacity."""
    try:
        cap = int(pltpu.get_tpu_info().vmem_capacity_bytes)
    except Exception:  # pragma: no cover - conservative fallback (v7x-sized)
        cap = 64 * _MIB
    hi = max(32 * _MIB, (6 * cap) // 10)
    return int(min(max(2 * int(estimate_bytes), 32 * _MIB), hi))


def _choose_block_h(h, target):
    """cdiv-based row blocking.  Returns (block_h, n_row_blocks, tail_rows)."""
    if h <= target + 2:
        return h, 1, h
    block_h = target
    n_r = -(-h // block_h)
    tail = h - (n_r - 1) * block_h
    return block_h, n_r, tail


# --------------------------------------------------------------------------- #
# 1x1 conv + folded BN + ReLU  (CSP conv1).  BN scale is folded into the weight
# at trace time, so the kernel is matmul + bias + ReLU.
# --------------------------------------------------------------------------- #
def _conv1x1_bn_act_kernel(x_ref, w_ref, b_ref, o_ref, *, sub_m):
    tm = x_ref.shape[0]
    for s in range(0, tm, sub_m):
        y = jnp.dot(x_ref[s:s + sub_m], w_ref[...],
                    preferred_element_type=jnp.float32)
        o_ref[s:s + sub_m] = jnp.maximum(y + b_ref[...], 0.0).astype(o_ref.dtype)


def conv1x1_bn_act(x2d, w, bias):
    """x2d: (M, Cin) -> (M, Cout) = relu(x @ w + bias)  (BN scale pre-folded)."""
    m, cin = x2d.shape
    cout = w.shape[1]
    tm = min(_TILE_M, m)
    sub_m = _SUB_M if (tm > _SUB_M and tm % _SUB_M == 0) else tm
    itm = x2d.dtype.itemsize
    flops = 2 * m * cin * cout
    bytes_accessed = (m * cin + m * cout + cin * cout) * itm + cout * 4
    vmem_est = (2 * tm * (cin + cout) * itm + cin * cout * itm
                + sub_m * cout * 4 + 2 * cout * 4)
    kernel = functools.partial(_conv1x1_bn_act_kernel, sub_m=sub_m)
    return pl.pallas_call(
        kernel,
        out_shape=jax.ShapeDtypeStruct((m, cout), x2d.dtype),
        grid=(pl.cdiv(m, tm),),
        in_specs=[
            pl.BlockSpec((tm, cin), lambda i: (i, 0)),
            pl.BlockSpec((cin, cout), lambda i: (0, 0)),
            pl.BlockSpec((1, cout), lambda i: (0, 0)),
        ],
        out_specs=pl.BlockSpec((tm, cout), lambda i: (i, 0)),
        compiler_params=pltpu.CompilerParams(
            dimension_semantics=("parallel",),
            vmem_limit_bytes=_vmem_limit(vmem_est)),
        cost_estimate=pl.CostEstimate(flops=int(flops), transcendentals=0,
                                      bytes_accessed=int(bytes_accessed)),
    )(x2d, w, bias)


# --------------------------------------------------------------------------- #
# Fused Bottleneck repeat:
#     y -> t = relu(bn1(conv1x1(y)))        (computed per halo window, in VMEM)
#       -> z = relu(bn2(conv3x3(t)))        (3 matmuls, K = 3*c_)
#       -> out = z + y (shortcut)           (residual read from the same window)
# Tiled over (batch, row-blocks); the halo'd y window is fetched by a manual,
# double-buffered DMA; zero padding for the 3x3 conv lives only in VMEM.
# --------------------------------------------------------------------------- #
def _bottleneck_fused_kernel(y_hbm, w1_ref, b1_ref, w2_ref, b2_ref, o_ref,
                             ybuf, tbuf, sem, *,
                             block_h, width, n_r, tail, c, add_residual):
    b = pl.program_id(0)
    r = pl.program_id(1)
    wh = block_h + 2                     # window rows held in ybuf / tbuf
    m = block_h * width

    # ---- fetch the halo'd y window (manual, double-buffered DMA) -------------
    if n_r == 1:
        slot = 0
        cp = pltpu.make_async_copy(y_hbm.at[b, pl.ds(0, block_h)],
                                   ybuf.at[0, pl.ds(1, block_h)],
                                   sem.at[0])
        cp.start()
        cp.wait()
    else:
        slot = r % 2

        def issue(rb, slot_idx, do_start):
            # Start or wait the window copy for row block `rb` of image `b`.
            # Each case has a static copy size; start/wait descriptors match
            # because both branch on the same `rb`.
            def run(desc):
                if do_start:
                    desc.start()
                else:
                    desc.wait()

            @pl.when(rb == 0)                         # top block: rows [0, bh+1)
            def _():
                run(pltpu.make_async_copy(
                    y_hbm.at[b, pl.ds(0, block_h + 1)],
                    ybuf.at[slot_idx, pl.ds(1, block_h + 1)],
                    sem.at[slot_idx]))

            @pl.when(rb == n_r - 1)                   # bottom block (maybe ragged)
            def _():
                run(pltpu.make_async_copy(
                    y_hbm.at[b, pl.ds(rb * block_h - 1, tail + 1)],
                    ybuf.at[slot_idx, pl.ds(0, tail + 1)],
                    sem.at[slot_idx]))

            if n_r > 2:                               # interior blocks
                @pl.when(jnp.logical_and(rb > 0, rb < n_r - 1))
                def _():
                    run(pltpu.make_async_copy(
                        y_hbm.at[b, pl.ds(rb * block_h - 1, block_h + 2)],
                        ybuf.at[slot_idx, pl.ds(0, block_h + 2)],
                        sem.at[slot_idx]))

        @pl.when(r == 0)          # cold start: first block of this image
        def _():
            issue(r, slot, do_start=True)

        issue(r, slot, do_start=False)                # wait for current window

        @pl.when(r + 1 < n_r)                         # prefetch next window
        def _():
            issue(r + 1, 1 - slot, do_start=True)

    # ---- Bottleneck cv1 (1x1 conv + folded BN + ReLU) on the window ----------
    ywin2d = ybuf[slot].reshape(wh * width, c)
    t = jnp.dot(ywin2d, w1_ref[...], preferred_element_type=jnp.float32)
    t = jnp.maximum(t + b1_ref[...], 0.0).astype(tbuf.dtype)
    tbuf[:, 1:width + 1, :] = t.reshape(wh, width, c)

    # Zero the padding rows / columns of the 3x3 input window (padding applies
    # to t, the conv input, so it is done after cv1 and only in VMEM).
    zrow = jnp.zeros((1, width + 2, c), tbuf.dtype)
    if n_r == 1:
        tbuf[0:1] = zrow
        tbuf[block_h + 1:wh] = zrow
    else:
        @pl.when(r == 0)
        def _():
            tbuf[0:1] = zrow

        @pl.when(r == n_r - 1)
        def _():
            tbuf[tail + 1:wh] = jnp.zeros((wh - tail - 1, width + 2, c),
                                          tbuf.dtype)

    zcol = jnp.zeros((wh, 1, c), tbuf.dtype)
    tbuf[:, 0:1, :] = zcol
    tbuf[:, width + 1:width + 2, :] = zcol

    # ---- cv2: 3x3 conv (+ folded BN) -- one matmul per kernel row ------------
    acc = None
    for dy in range(3):
        taps = [tbuf[dy:dy + block_h, dx:dx + width, :] for dx in range(3)]
        patch = jnp.concatenate(taps, axis=-1).reshape(m, 3 * c)
        part = jnp.dot(patch, w2_ref[dy], preferred_element_type=jnp.float32)
        acc = part if acc is None else acc + part

    out = jnp.maximum(acc + b2_ref[...], 0.0)         # BN bias + ReLU
    if add_residual:
        # Shortcut is added after the activation (matches PyTorch); the rows we
        # need are already resident in the DMA'd window.
        out = out + ywin2d[width:width + m].astype(jnp.float32)
    o_ref[0] = out.reshape(block_h, width, c).astype(o_ref.dtype)


def bottleneck_fused(y_nhwc, w1f, b1, w2r, b2, add_residual,
                     block_h_target=_BLOCK_H_TARGET):
    """One Bottleneck repeat.  y_nhwc: (N,H,W,c_); w1f: (c_,c_); w2r: (3,3c_,c_)."""
    n, h, wd, c = y_nhwc.shape
    block_h, n_r, tail = _choose_block_h(h, block_h_target)
    n_buf = 1 if n_r == 1 else 2
    itm = y_nhwc.dtype.itemsize

    flops = 2 * n * h * wd * c * c * 10               # cv1 (1x) + cv2 (9x)
    bytes_accessed = (2 * n * h * wd * c + 10 * c * c) * itm + 2 * c * 4
    vmem_est = (n_buf * (block_h + 2) * wd * c * itm          # y window buffers
                + (block_h + 2) * (wd + 2) * c * itm          # t window
                + 2 * block_h * wd * c * itm                  # output blocks
                + block_h * wd * (3 * c * itm + c * 4)        # patch + f32 acc
                + (block_h + 2) * wd * c * 4                  # cv1 f32 interm.
                + 10 * c * c * itm)                           # weights

    kernel = functools.partial(
        _bottleneck_fused_kernel, block_h=block_h, width=wd, n_r=n_r,
        tail=tail, c=c, add_residual=add_residual)

    return pl.pallas_call(
        kernel,
        out_shape=jax.ShapeDtypeStruct((n, h, wd, c), y_nhwc.dtype),
        grid=(n, n_r),
        in_specs=[
            pl.BlockSpec(memory_space=pl.ANY),                 # y, manual DMA
            pl.BlockSpec((c, c), lambda b, r: (0, 0)),         # cv1 weight
            pl.BlockSpec((1, c), lambda b, r: (0, 0)),         # cv1 BN bias
            pl.BlockSpec((3, 3 * c, c), lambda b, r: (0, 0, 0)),  # cv2 weight
            pl.BlockSpec((1, c), lambda b, r: (0, 0)),         # cv2 BN bias
        ],
        out_specs=pl.BlockSpec((1, block_h, wd, c), lambda b, r: (b, r, 0, 0)),
        scratch_shapes=[
            pltpu.VMEM((n_buf, block_h + 2, wd, c), y_nhwc.dtype),   # y window
            pltpu.VMEM((block_h + 2, wd + 2, c), y_nhwc.dtype),      # t window
            pltpu.SemaphoreType.DMA((n_buf,)),
        ],
        compiler_params=pltpu.CompilerParams(
            dimension_semantics=("parallel", "arbitrary"),
            vmem_limit_bytes=_vmem_limit(vmem_est)),
        cost_estimate=pl.CostEstimate(flops=int(flops), transcendentals=0,
                                      bytes_accessed=int(bytes_accessed)),
    )(y_nhwc, w1f, b1, w2r, b2)


# --------------------------------------------------------------------------- #
# Fused tail: conv3(y), conv2(x), concat-BN + ReLU, conv4 + BN + ReLU.
# The concat-BN affine is folded into the conv3/conv2 weights, BN4's scale into
# conv4's weight, and conv4's weight is split row-wise, so the (M, 2*c_) concat
# never materializes.  Each 512-row tile is processed in 256-row sub-tiles.
# --------------------------------------------------------------------------- #
def _csp_tail_kernel(y_ref, x_ref, w3_ref, b3_ref, w2_ref, b2_ref,
                     w4a_ref, w4b_ref, b4_ref, o_ref, *, sub_m):
    tm = y_ref.shape[0]
    for s in range(0, tm, sub_m):
        z1 = jnp.dot(y_ref[s:s + sub_m], w3_ref[...],
                     preferred_element_type=jnp.float32)
        z1 = jnp.maximum(z1 + b3_ref[...], 0.0)       # conv3 + concat-BN + ReLU
        z2 = jnp.dot(x_ref[s:s + sub_m], w2_ref[...],
                     preferred_element_type=jnp.float32)
        z2 = jnp.maximum(z2 + b2_ref[...], 0.0)       # conv2 + concat-BN + ReLU
        acc = jnp.dot(z1.astype(w4a_ref.dtype), w4a_ref[...],
                      preferred_element_type=jnp.float32)
        acc = acc + jnp.dot(z2.astype(w4b_ref.dtype), w4b_ref[...],
                            preferred_element_type=jnp.float32)
        o_ref[s:s + sub_m] = jnp.maximum(acc + b4_ref[...],
                                         0.0).astype(o_ref.dtype)


def _bcast_spec(shape):
    return pl.BlockSpec(shape, lambda i: (0,) * len(shape))


def csp_tail(y2d, x2d, w3f, b3, w2f, b2, w4a, w4b, b4):
    m, c_ = y2d.shape
    cin = x2d.shape[1]
    cout = w4a.shape[1]
    tm = min(_TILE_M, m)
    sub_m = _SUB_M if (tm > _SUB_M and tm % _SUB_M == 0) else tm
    itm = y2d.dtype.itemsize
    flops = 2 * m * (c_ * c_ + cin * c_ + 2 * c_ * cout)
    bytes_accessed = ((m * (c_ + cin + cout)
                       + c_ * c_ + cin * c_ + 2 * c_ * cout) * itm
                      + (2 * c_ + cout) * 4)
    vmem_est = (2 * tm * (c_ + cin + cout) * itm
                + (c_ * c_ + cin * c_ + 2 * c_ * cout) * itm
                + sub_m * (2 * c_ + cout) * 4)
    kernel = functools.partial(_csp_tail_kernel, sub_m=sub_m)
    return pl.pallas_call(
        kernel,
        out_shape=jax.ShapeDtypeStruct((m, cout), y2d.dtype),
        grid=(pl.cdiv(m, tm),),
        in_specs=[
            pl.BlockSpec((tm, c_), lambda i: (i, 0)),
            pl.BlockSpec((tm, cin), lambda i: (i, 0)),
            _bcast_spec((c_, c_)), _bcast_spec((1, c_)),
            _bcast_spec((cin, c_)), _bcast_spec((1, c_)),
            _bcast_spec((c_, cout)), _bcast_spec((c_, cout)),
            _bcast_spec((1, cout)),
        ],
        out_specs=pl.BlockSpec((tm, cout), lambda i: (i, 0)),
        compiler_params=pltpu.CompilerParams(
            dimension_semantics=("parallel",),
            vmem_limit_bytes=_vmem_limit(vmem_est)),
        cost_estimate=pl.CostEstimate(flops=int(flops), transcendentals=0,
                                      bytes_accessed=int(bytes_accessed)),
    )(y2d, x2d, w3f, b3, w2f, b2, w4a, w4b, b4)


# --------------------------------------------------------------------------- #
# Deterministic synthetic parameters (matching the module's shapes)
# --------------------------------------------------------------------------- #
def _fold_bn(key, c, eps=1e-5):
    k1, k2, k3, k4 = jax.random.split(key, 4)
    gamma = 1.0 + 0.1 * jax.random.normal(k1, (c,), jnp.float32)
    beta = 0.1 * jax.random.normal(k2, (c,), jnp.float32)
    mean = 0.1 * jax.random.normal(k3, (c,), jnp.float32)
    var = jax.random.uniform(k4, (c,), jnp.float32, 0.5, 1.5)
    scale = gamma * jax.lax.rsqrt(var + eps)
    bias = beta - mean * scale
    return scale.reshape(1, c), bias.reshape(1, c)


def init_params(key, in_channels, out_channels, n_repeat=1, shortcut=True,
                expansion=0.5):
    c_ = int(out_channels * expansion)
    ks = jax.random.split(key, 8 + n_repeat)
    w_scale = 0.2
    p = {"c_": c_, "out_channels": out_channels}
    # conv1: Conv(in, c_, 1) = conv + BN + ReLU
    p["w1"] = w_scale * jax.random.normal(ks[0], (in_channels, c_), jnp.float32)
    p["s1"], p["b1"] = _fold_bn(ks[1], c_)
    # conv2 / conv3: plain nn.Conv2d 1x1, bias=False
    p["w2"] = w_scale * jax.random.normal(ks[2], (in_channels, c_), jnp.float32)
    p["w3"] = w_scale * jax.random.normal(ks[3], (c_, c_), jnp.float32)
    # conv4: Conv(2*c_, out, 1) = conv + BN + ReLU
    p["w4"] = w_scale * jax.random.normal(ks[4], (2 * c_, out_channels),
                                          jnp.float32)
    p["s4"], p["b4"] = _fold_bn(ks[5], out_channels)
    # standalone BatchNorm2d over the concatenated 2*c_ channels
    p["bn_s"], p["bn_b"] = _fold_bn(ks[6], 2 * c_)
    # Bottleneck stack (expansion=1.0 inside Bottleneck -> hidden == c_)
    blocks = []
    for rpt in range(n_repeat):
        kb = jax.random.split(ks[7 + rpt], 4)
        blk = {
            "w1": w_scale * jax.random.normal(kb[0], (c_, c_), jnp.float32),
            "w2": w_scale * jax.random.normal(kb[1], (3, 3, c_, c_),
                                              jnp.float32),
            "shortcut": bool(shortcut),   # in == out inside the Bottleneck
        }
        blk["s1"], blk["b1"] = _fold_bn(kb[2], c_)
        blk["s2"], blk["b2"] = _fold_bn(kb[3], c_)
        blocks.append(blk)
    p["blocks"] = blocks
    return p


# --------------------------------------------------------------------------- #
# Forward (glue in plain JAX, hot paths in Pallas)
# --------------------------------------------------------------------------- #
def bottleneck_csp_forward(x_nchw, p, block_h_target=_BLOCK_H_TARGET):
    n, cin, h, w = x_nchw.shape
    c_ = p["c_"]
    cout = p["out_channels"]
    dt = _COMPUTE_DTYPE

    x = jnp.transpose(x_nchw, (0, 2, 3, 1)).astype(dt)        # NCHW -> NHWC
    x2d = x.reshape(n * h * w, cin)

    # CSP conv1 (1x1 conv + BN + ReLU); BN scale folded into the weight.
    w1f = (p["w1"] * p["s1"]).astype(dt)
    y = conv1x1_bn_act(x2d, w1f, p["b1"])
    y_nhwc = y.reshape(n, h, w, c_)

    # bottleneck_csp = Sequential(Bottleneck(c_, c_, expansion=1.0) * n_repeat)
    for blk in p["blocks"]:
        bw1 = (blk["w1"] * blk["s1"]).astype(dt)               # cv1 + BN1 scale
        bw2 = (blk["w2"] * blk["s2"].reshape(1, 1, 1, c_))     # cv2 + BN2 scale
        bw2 = bw2.reshape(3, 3 * c_, c_).astype(dt)
        y_nhwc = bottleneck_fused(y_nhwc, bw1, blk["b1"], bw2, blk["b2"],
                                  blk["shortcut"], block_h_target)

    y2d = y_nhwc.reshape(n * h * w, c_)

    # Fused tail: conv3(y) / conv2(x) / concat-BN / ReLU / conv4 + BN + ReLU.
    bn_s, bn_b = p["bn_s"], p["bn_b"]
    w3f = (p["w3"] * bn_s[:, :c_]).astype(dt)
    b3 = bn_b[:, :c_]
    w2f = (p["w2"] * bn_s[:, c_:]).astype(dt)
    b2 = bn_b[:, c_:]
    w4a = (p["w4"][:c_] * p["s4"]).astype(dt)   # rows hitting the conv3 half
    w4b = (p["w4"][c_:] * p["s4"]).astype(dt)   # rows hitting the conv2 half
    out2d = csp_tail(y2d, x2d, w3f, b3, w2f, b2, w4a, w4b, p["b4"])

    out = out2d.reshape(n, h, w, cout).astype(x_nchw.dtype)
    return jnp.transpose(out, (0, 3, 1, 2))                   # NHWC -> NCHW


# --------------------------------------------------------------------------- #
if __name__ == "__main__":
    key = jax.random.PRNGKey(0)
    kx, kp = jax.random.split(key)
    N, C, H, W = 2, 8, 16, 16
    x = jax.random.normal(kx, (N, C, H, W), jnp.float32)
    params = init_params(kp, in_channels=C, out_channels=C, n_repeat=2,
                         shortcut=True, expansion=0.5)
    # block_h_target=8 with H=16 -> 2 row blocks per image, so the in-VMEM halo
    # stitching and the double-buffered DMA prefetch path are exercised.
    out = bottleneck_csp_forward(x, params, block_h_target=8)
    out = jax.block_until_ready(out)
    assert out.shape == (N, C, H, W), out.shape
    assert bool(jnp.all(jnp.isfinite(out)))
    print("KERNEL_OK")
</pallas_src>

<mosaic_0001>
module attributes {stable_mosaic.version = 11 : i64} {
  func.func @_conv1x1_bn_act_kernel(%arg0: i32, %arg1: memref<512x8xbf16, #tpu.memory_space<vmem>>, %arg2: memref<8x4xbf16, #tpu.memory_space<vmem>>, %arg3: memref<1x4xf32, #tpu.memory_space<vmem>>, %arg4: memref<512x4xbf16, #tpu.memory_space<vmem>>) attributes {dimension_semantics = [#tpu.dimension_semantics<parallel>], iteration_bounds = array<i64: 1>, scalar_prefetch = 0 : i64, scratch_operands = 0 : i64, tpu.core_type = #tpu.core_type<tc>, window_params = [{transform_indices = @transform_0, window_bounds = array<i64: 512, 8>}, {pipeline_mode = #tpu.pipeline_mode<synchronous>, transform_indices = @transform_1, window_bounds = array<i64: 8, 4>}, {pipeline_mode = #tpu.pipeline_mode<synchronous>, transform_indices = @transform_2, window_bounds = array<i64: 1, 4>}, {transform_indices = @transform_3, window_bounds = array<i64: 512, 4>}]} {
    %c0 = arith.constant 0 : index
    %c0_0 = arith.constant 0 : index
    %0 = vector.load %arg1[%c0, %c0_0] : memref<512x8xbf16, #tpu.memory_space<vmem>>, vector<256x8xbf16>
    %c0_1 = arith.constant 0 : index
    %c0_2 = arith.constant 0 : index
    %1 = vector.load %arg2[%c0_1, %c0_2] : memref<8x4xbf16, #tpu.memory_space<vmem>>, vector<8x4xbf16>
    %cst = arith.constant dense<0.000000e+00> : vector<256x4xf32>
    %2 = tpu.matmul %0, %1, %cst {dimension_numbers = #tpu.dot_dimension_numbers<[1], [0], [0], [1], [0, 0, 1, 1], [], []>} : vector<256x8xbf16>, vector<8x4xbf16>, vector<256x4xf32> -> vector<256x4xf32>
    %c0_3 = arith.constant 0 : index
    %c0_4 = arith.constant 0 : index
    %3 = vector.load %arg3[%c0_3, %c0_4] : memref<1x4xf32, #tpu.memory_space<vmem>>, vector<1x4xf32>
    %4 = vector.broadcast %3 : vector<1x4xf32> to vector<256x4xf32>
    %5 = arith.addf %2, %4 : vector<256x4xf32>
    %cst_5 = arith.constant 0.000000e+00 : f32
    %6 = vector.broadcast %cst_5 : f32 to vector<256x4xf32>
    %7 = arith.maximumf %5, %6 : vector<256x4xf32>
    %8 = arith.truncf %7 : vector<256x4xf32> to vector<256x4xbf16>
    %c0_6 = arith.constant 0 : index
    %c0_7 = arith.constant 0 : index
    %9 = vector.load %arg4[%c0_6, %c0_7] : memref<512x4xbf16, #tpu.memory_space<vmem>>, vector<256x4xbf16>
    tpu.vector_store %arg4[%c0_6, %c0_7], %8 {strides = array<i32>} : memref<512x4xbf16, #tpu.memory_space<vmem>>, vector<256x4xbf16>,
    %c256 = arith.constant 256 : index
    %c0_8 = arith.constant 0 : index
    %10 = vector.load %arg1[%c256, %c0_8] : memref<512x8xbf16, #tpu.memory_space<vmem>>, vector<256x8xbf16>
    %c0_9 = arith.constant 0 : index
    %c0_10 = arith.constant 0 : index
    %11 = vector.load %arg2[%c0_9, %c0_10] : memref<8x4xbf16, #tpu.memory_space<vmem>>, vector<8x4xbf16>
    %cst_11 = arith.constant dense<0.000000e+00> : vector<256x4xf32>
    %12 = tpu.matmul %10, %11, %cst_11 {dimension_numbers = #tpu.dot_dimension_numbers<[1], [0], [0], [1], [0, 0, 1, 1], [], []>} : vector<256x8xbf16>, vector<8x4xbf16>, vector<256x4xf32> -> vector<256x4xf32>
    %c0_12 = arith.constant 0 : index
    %c0_13 = arith.constant 0 : index
    %13 = vector.load %arg3[%c0_12, %c0_13] : memref<1x4xf32, #tpu.memory_space<vmem>>, vector<1x4xf32>
    %14 = vector.broadcast %13 : vector<1x4xf32> to vector<256x4xf32>
    %15 = arith.addf %12, %14 : vector<256x4xf32>
    %cst_14 = arith.constant 0.000000e+00 : f32
    %16 = vector.broadcast %cst_14 : f32 to vector<256x4xf32>
    %17 = arith.maximumf %15, %16 : vector<256x4xf32>
    %18 = arith.truncf %17 : vector<256x4xf32> to vector<256x4xbf16>
    %c256_15 = arith.constant 256 : index
    %c0_16 = arith.constant 0 : index
    %19 = vector.load %arg4[%c256_15, %c0_16] : memref<512x4xbf16, #tpu.memory_space<vmem>>, vector<256x4xbf16>
    tpu.vector_store %arg4[%c256_15, %c0_16], %18 {strides = array<i32>} : memref<512x4xbf16, #tpu.memory_space<vmem>>, vector<256x4xbf16>,
    return
  }
  func.func @transform_0(%arg0: i32) -> (i32, i32) {
    %c0_i32 = arith.constant 0 : i32
    %c0_i32_0 = arith.constant 0 : i32
    return %arg0, %c0_i32 : i32, i32
  }
  func.func @transform_1(%arg0: i32) -> (i32, i32) {
    %c0_i32 = arith.constant 0 : i32
    %c0_i32_0 = arith.constant 0 : i32
    %c0_i32_1 = arith.constant 0 : i32
    return %c0_i32, %c0_i32_0 : i32, i32
  }
  func.func @transform_2(%arg0: i32) -> (i32, i32) {
    %c0_i32 = arith.constant 0 : i32
    %c0_i32_0 = arith.constant 0 : i32
    %c0_i32_1 = arith.constant 0 : i32
    return %c0_i32, %c0_i32_0 : i32, i32
  }
  func.func @transform_3(%arg0: i32) -> (i32, i32) {
    %c0_i32 = arith.constant 0 : i32
    %c0_i32_0 = arith.constant 0 : i32
    return %arg0, %c0_i32 : i32, i32
  }
}

</mosaic_0001>

<bundles_post_ra>
// kernel: tpu_custom_call.1
= control target key start
LH: loop header
LB: loop body
LE: loop exit
PB: predicated region body
PF: predicated region fallthrough
CT: control target
= control target key end

     0   :  { %vm181_vm0 = vcmask 1043456   ;;  %vm132_vm1 = vcmask 64512   ;;  %vm338_vm2 = vcmask 27648   ;;  %s1408_s1 = inlined_call_operand.vmem [shape: bf16[8,4], index: 1, kind: input, shape index: {}]   ;;  %s1409_s0 = inlined_call_operand.vmem [shape: bf16[512,8], index: 0, kind: input, shape index: {}]   ;;  %s1410_s2 = inlined_call_operand.vmem [shape: f32[1,4], index: 2, kind: input, shape index: {}]   ;;  %s1411_s3 = inlined_call_operand.vmem [shape: bf16[512,4], index: 3, kind: output, shape index: {}]  }
   0x1   :  { %v47_v0 = vld [vmem:[%s1408_s1] sm:$0xf]  ;;  %v889_v8 = vld [vmem:[%s1409_s0 + $0x8] sm:$0xff]  ;;  %v890_v12 = vld [vmem:[%s1409_s0 + $0x10] sm:$0xff] }
   0x2   :  { %v403_v1 = vld [vmem:[%s1408_s1] sm:$0xf]  ;;  %v183_v2 = vsel %vm181_vm0, %v47_v0, 0  ;;  %v897_v9 = vld [vmem:[%s1409_s0 + $0x48] sm:$0xff]  ;;  %v898_v13 = vld [vmem:[%s1409_s0 + $0x50] sm:$0xff] }
   0x3   :  { %v537_v3 = vsel %vm181_vm0, %v403_v1, 0  ;;  %v888_v4 = vld [vmem:[%s1409_s0] sm:$0xff]  ;;  %192 = vmatpush.bf16.msra.mxu0 %v183_v2  ;;  %920 = vmatpush.bf16.msra.mxu2 %v183_v2  ;;  %v905_v10 = vld [vmem:[%s1409_s0 + $0x88] sm:$0xff]  ;;  %v906_v14 = vld [vmem:[%s1409_s0 + $0x90] sm:$0xff] }
   0x4   :  { %v896_v5 = vld [vmem:[%s1409_s0 + $0x40] sm:$0xff]  ;;  %546 = vmatpush.bf16.msra.mxu1 %v537_v3  ;;  %921 = vmatpush.bf16.msra.mxu3 %v537_v3  ;;  %v913_v11 = vld [vmem:[%s1409_s0 + $0xc8] sm:$0xff]  ;;  %v914_v15 = vld [vmem:[%s1409_s0 + $0xd0] sm:$0xff] }
   0x5   :  { %v904_v6 = vld [vmem:[%s1409_s0 + $0x80] sm:$0xff]  ;;  %v891_v16 = vld [vmem:[%s1409_s0 + $0x18] sm:$0xff]  ;;  %v893_v24 = vld [vmem:[%s1409_s0 + $0x28] sm:$0xff] }
   0x6   :  { %v912_v7 = vld [vmem:[%s1409_s0 + $0xc0] sm:$0xff]  ;;  %792 = vmatmul.msk.bf16.vlgmr.msra.gmra.mxu0 %vm132_vm1, %v888_v4  ;;  %800 = vmatmul.msk.bf16.vlgmr.msra.gmra.mxu2 %vm132_vm1, %v896_v5  ;;  %v899_v17 = vld [vmem:[%s1409_s0 + $0x58] sm:$0xff]  ;;  %v901_v25 = vld [vmem:[%s1409_s0 + $0x68] sm:$0xff] }
   0x7   :  { %872 = vmatmul.msk.bf16.vlgmr.msra.gmra.mxu1 %vm132_vm1, %v904_v6  ;;  %880 = vmatmul.msk.bf16.vlgmr.msra.gmra.mxu3 %vm132_vm1, %v912_v7  ;;  %v907_v18 = vld [vmem:[%s1409_s0 + $0x98] sm:$0xff]  ;;  %v892_v20 = vld [vmem:[%s1409_s0 + $0x20] sm:$0xff]  ;;  %v909_v26 = vld [vmem:[%s1409_s0 + $0xa8] sm:$0xff] }
   0x8   :  { %v915_v19 = vld [vmem:[%s1409_s0 + $0xd8] sm:$0xff]  ;;  %v900_v21 = vld [vmem:[%s1409_s0 + $0x60] sm:$0xff]  ;;  %v917_v27 = vld [vmem:[%s1409_s0 + $0xe8] sm:$0xff] }
   0x9   :  { %v908_v22 = vld [vmem:[%s1409_s0 + $0xa0] sm:$0xff]  ;;  %v894_v28 = vld [vmem:[%s1409_s0 + $0x30] sm:$0xff]  ;;  %v895_v32 = vld [vmem:[%s1409_s0 + $0x38] sm:$0xff] }
   0xa   :  { %v916_v23 = vld [vmem:[%s1409_s0 + $0xe0] sm:$0xff]  ;;  %v902_v29 = vld [vmem:[%s1409_s0 + $0x70] sm:$0xff]  ;;  %v903_v33 = vld [vmem:[%s1409_s0 + $0x78] sm:$0xff] }
   0xb   :  { %v910_v30 = vld [vmem:[%s1409_s0 + $0xb0] sm:$0xff]  ;;  %v911_v34 = vld [vmem:[%s1409_s0 + $0xb8] sm:$0xff]  ;;  %v1081_v36 = vld [vmem:[%s1410_s2] ss:$0 sm:$0xff] }
   0xc   :  { %v918_v31 = vld [vmem:[%s1409_s0 + $0xf0] sm:$0xff]  ;;  %v919_v35 = vld [vmem:[%s1409_s0 + $0xf8] sm:$0xff]  ;;  %v1086_v37 = vld [vmem:[%s1410_s2] ss:$0 sm:$0xff] }
  0x16   :  { %793 = vmatmul.msk.bf16.gmra.mxu0 %vm132_vm1, %v889_v8  ;;  %801 = vmatmul.msk.bf16.gmra.mxu2 %vm132_vm1, %v897_v9 }
  0x17   :  { %873 = vmatmul.msk.bf16.gmra.mxu1 %vm132_vm1, %v905_v10  ;;  %881 = vmatmul.msk.bf16.gmra.mxu3 %vm132_vm1, %v913_v11 }
  0x26   :  { %794 = vmatmul.msk.bf16.gmra.mxu0 %vm132_vm1, %v890_v12  ;;  %802 = vmatmul.msk.bf16.gmra.mxu2 %vm132_vm1, %v898_v13 }
  0x27   :  { %874 = vmatmul.msk.bf16.gmra.mxu1 %vm132_vm1, %v906_v14  ;;  %882 = vmatmul.msk.bf16.gmra.mxu3 %vm132_vm1, %v914_v15 }
  0x36   :  { %795 = vmatmul.msk.bf16.gmra.mxu0 %vm132_vm1, %v891_v16  ;;  %803 = vmatmul.msk.bf16.gmra.mxu2 %vm132_vm1, %v899_v17 }
  0x37   :  { %875 = vmatmul.msk.bf16.gmra.mxu1 %vm132_vm1, %v907_v18  ;;  %883 = vmatmul.msk.bf16.gmra.mxu3 %vm132_vm1, %v915_v19 }
  0x46   :  { %796 = vmatmul.msk.bf16.gmra.mxu0 %vm132_vm1, %v892_v20  ;;  %804 = vmatmul.msk.bf16.gmra.mxu2 %vm132_vm1, %v900_v21 }
  0x47   :  { %876 = vmatmul.msk.bf16.gmra.mxu1 %vm132_vm1, %v908_v22  ;;  %884 = vmatmul.msk.bf16.gmra.mxu3 %vm132_vm1, %v916_v23 }
  0x56   :  { %797 = vmatmul.msk.bf16.gmra.mxu0 %vm132_vm1, %v893_v24  ;;  %805 = vmatmul.msk.bf16.gmra.mxu2 %vm132_vm1, %v901_v25 }
  0x57   :  { %877 = vmatmul.msk.bf16.gmra.mxu1 %vm132_vm1, %v909_v26  ;;  %885 = vmatmul.msk.bf16.gmra.mxu3 %vm132_vm1, %v917_v27 }
  0x66   :  { %798 = vmatmul.msk.bf16.gmra.mxu0 %vm132_vm1, %v894_v28  ;;  %806 = vmatmul.msk.bf16.gmra.mxu2 %vm132_vm1, %v902_v29 }
  0x67   :  { %878 = vmatmul.msk.bf16.gmra.mxu1 %vm132_vm1, %v910_v30  ;;  %886 = vmatmul.msk.bf16.gmra.mxu3 %vm132_vm1, %v918_v31 }
  0x76   :  { %799 = vmatmul.msk.bf16.gmra.mxu0 %vm132_vm1, %v895_v32  ;;  %807 = vmatmul.msk.bf16.gmra.mxu2 %vm132_vm1, %v903_v33 }
  0x77   :  { %879 = vmatmul.msk.bf16.gmra.mxu1 %vm132_vm1, %v911_v34  ;;  %887 = vmatmul.msk.bf16.gmra.mxu3 %vm132_vm1, %v919_v35 }
  0x83   :  { %v194_v38 = vpop.f32.mrf.mxu0 }
  0x84   :  { %v195_v39 = vadd.f32 %v1081_v36, %v194_v38  ;;  %v548_v40 = vpop.f32.mrf.mxu1 }
  0x85   :  { %v549_v41 = vadd.f32 %v1086_v37, %v548_v40 }
  0x86   :  { %v274_v42 = vmax.f32 %v195_v39, 0.0 }
  0x87   :  { %v628_v43 = vmax.f32 %v549_v41, 0.0 }
  0x88   :  { %v306_v44 = vpack.c.bf16 %v274_v42, %v274_v42 }
  0x89   :  { %v660_v45 = vpack.c.bf16 %v628_v43, %v628_v43  ;;  %v234_v46 = vpop.f32.mrf.mxu2 }
  0x8a   :  { %339 = vst.msk [vmem:[%s1411_s3] sm:$0xf] %vm338_vm2, %v306_v44  ;;  %v235_v47 = vadd.f32 %v1081_v36, %v234_v46  ;;  %v588_v48 = vpop.f32.mrf.mxu3 }
  0x8b   :  { %692 = vst.msk [vmem:[%s1411_s3 + $0x80] sm:$0xf] %vm338_vm2, %v660_v45  ;;  %v589_v49 = vadd.f32 %v1086_v37, %v588_v48  ;;  %v196_v50 = vpop.f32.mrf.mxu0 }
  0x8c   :  { %v290_v51 = vmax.f32 %v235_v47, 0.0  ;;  %v197_v52 = vadd.f32 %v1081_v36, %v196_v50  ;;  %v550_v53 = vpop.f32.mrf.mxu1 }
  0x8d   :  { %v644_v54 = vmax.f32 %v589_v49, 0.0  ;;  %v551_v55 = vadd.f32 %v1086_v37, %v550_v53 }
  0x8e   :  { %v322_v56 = vpack.c.bf16 %v290_v51, %v290_v51  ;;  %v275_v57 = vmax.f32 %v197_v52, 0.0 }
  0x8f   :  { %v676_v58 = vpack.c.bf16 %v644_v54, %v644_v54  ;;  %v629_v59 = vmax.f32 %v551_v55, 0.0 }
  0x90   :  { %355 = vst.msk [vmem:[%s1411_s3 + $0x40] sm:$0xf] %vm338_vm2, %v322_v56  ;;  %v307_v60 = vpack.c.bf16 %v275_v57, %v275_v57 }
  0x91   :  { %708 = vst.msk [vmem:[%s1411_s3 + $0xc0] sm:$0xf] %vm338_vm2, %v676_v58  ;;  %v661_v61 = vpack.c.bf16 %v629_v59, %v629_v59  ;;  %v236_v62 = vpop.f32.mrf.mxu2 }
  0x92   :  { %340 = vst.msk [vmem:[%s1411_s3 + $0x4] sm:$0xf] %vm338_vm2, %v307_v60  ;;  %v237_v63 = vadd.f32 %v1081_v36, %v236_v62  ;;  %v590_v0 = vpop.f32.mrf.mxu3 }
  0x93   :  { %693 = vst.msk [vmem:[%s1411_s3 + $0x84] sm:$0xf] %vm338_vm2, %v661_v61  ;;  %v591_v1 = vadd.f32 %v1086_v37, %v590_v0  ;;  %v199_v2 = vpop.f32.mrf.mxu0 }
  0x94   :  { %v291_v3 = vmax.f32 %v237_v63, 0.0  ;;  %v200_v4 = vadd.f32 %v1081_v36, %v199_v2  ;;  %v553_v5 = vpop.f32.mrf.mxu1 }
  0x95   :  { %v645_v6 = vmax.f32 %v591_v1, 0.0  ;;  %v554_v7 = vadd.f32 %v1086_v37, %v553_v5 }
  0x96   :  { %v323_v8 = vpack.c.bf16 %v291_v3, %v291_v3  ;;  %v276_v9 = vmax.f32 %v200_v4, 0.0 }
  0x97   :  { %v677_v10 = vpack.c.bf16 %v645_v6, %v645_v6  ;;  %v630_v11 = vmax.f32 %v554_v7, 0.0 }
  0x98   :  { %356 = vst.msk [vmem:[%s1411_s3 + $0x44] sm:$0xf] %vm338_vm2, %v323_v8  ;;  %v308_v12 = vpack.c.bf16 %v276_v9, %v276_v9 }
  0x99   :  { %709 = vst.msk [vmem:[%s1411_s3 + $0xc4] sm:$0xf] %vm338_vm2, %v677_v10  ;;  %v662_v13 = vpack.c.bf16 %v630_v11, %v630_v11  ;;  %v239_v14 = vpop.f32.mrf.mxu2 }
  0x9a   :  { %341 = vst.msk [vmem:[%s1411_s3 + $0x8] sm:$0xf] %vm338_vm2, %v308_v12  ;;  %v240_v15 = vadd.f32 %v1081_v36, %v239_v14  ;;  %v593_v16 = vpop.f32.mrf.mxu3 }
  0x9b   :  { %694 = vst.msk [vmem:[%s1411_s3 + $0x88] sm:$0xf] %vm338_vm2, %v662_v13  ;;  %v594_v17 = vadd.f32 %v1086_v37, %v593_v16  ;;  %v201_v18 = vpop.f32.mrf.mxu0 }
  0x9c   :  { %v292_v19 = vmax.f32 %v240_v15, 0.0  ;;  %v202_v20 = vadd.f32 %v1081_v36, %v201_v18  ;;  %v555_v21 = vpop.f32.mrf.mxu1 }
  0x9d   :  { %v646_v22 = vmax.f32 %v594_v17, 0.0  ;;  %v556_v23 = vadd.f32 %v1086_v37, %v555_v21 }
  0x9e   :  { %v324_v24 = vpack.c.bf16 %v292_v19, %v292_v19  ;;  %v277_v25 = vmax.f32 %v202_v20, 0.0 }
  0x9f   :  { %v678_v26 = vpack.c.bf16 %v646_v22, %v646_v22  ;;  %v631_v27 = vmax.f32 %v556_v23, 0.0 }
  0xa0   :  { %357 = vst.msk [vmem:[%s1411_s3 + $0x48] sm:$0xf] %vm338_vm2, %v324_v24  ;;  %v309_v28 = vpack.c.bf16 %v277_v25, %v277_v25 }
  0xa1   :  { %710 = vst.msk [vmem:[%s1411_s3 + $0xc8] sm:$0xf] %vm338_vm2, %v678_v26  ;;  %v663_v29 = vpack.c.bf16 %v631_v27, %v631_v27  ;;  %v241_v30 = vpop.f32.mrf.mxu2 }
  0xa2   :  { %342 = vst.msk [vmem:[%s1411_s3 + $0xc] sm:$0xf] %vm338_vm2, %v309_v28  ;;  %v242_v31 = vadd.f32 %v1081_v36, %v241_v30  ;;  %v595_v32 = vpop.f32.mrf.mxu3 }
  0xa3   :  { %695 = vst.msk [vmem:[%s1411_s3 + $0x8c] sm:$0xf] %vm338_vm2, %v663_v29  ;;  %v596_v33 = vadd.f32 %v1086_v37, %v595_v32  ;;  %v204_v34 = vpop.f32.mrf.mxu0 }
  0xa4   :  { %v293_v35 = vmax.f32 %v242_v31, 0.0  ;;  %v205_v38 = vadd.f32 %v1081_v36, %v204_v34  ;;  %v558_v39 = vpop.f32.mrf.mxu1 }
  0xa5   :  { %v647_v40 = vmax.f32 %v596_v33, 0.0  ;;  %v559_v41 = vadd.f32 %v1086_v37, %v558_v39 }
  0xa6   :  { %v325_v42 = vpack.c.bf16 %v293_v35, %v293_v35  ;;  %v278_v43 = vmax.f32 %v205_v38, 0.0 }
  0xa7   :  { %v679_v44 = vpack.c.bf16 %v647_v40, %v647_v40  ;;  %v632_v45 = vmax.f32 %v559_v41, 0.0 }
  0xa8   :  { %358 = vst.msk [vmem:[%s1411_s3 + $0x4c] sm:$0xf] %vm338_vm2, %v325_v42  ;;  %v310_v46 = vpack.c.bf16 %v278_v43, %v278_v43 }
  0xa9   :  { %711 = vst.msk [vmem:[%s1411_s3 + $0xcc] sm:$0xf] %vm338_vm2, %v679_v44  ;;  %v664_v47 = vpack.c.bf16 %v632_v45, %v632_v45  ;;  %v244_v48 = vpop.f32.mrf.mxu2 }
  0xaa   :  { %343 = vst.msk [vmem:[%s1411_s3 + $0x10] sm:$0xf] %vm338_vm2, %v310_v46  ;;  %v245_v49 = vadd.f32 %v1081_v36, %v244_v48  ;;  %v598_v50 = vpop.f32.mrf.mxu3 }
  0xab   :  { %696 = vst.msk [vmem:[%s1411_s3 + $0x90] sm:$0xf] %vm338_vm2, %v664_v47  ;;  %v599_v51 = vadd.f32 %v1086_v37, %v598_v50  ;;  %v206_v52 = vpop.f32.mrf.mxu0 }
  0xac   :  { %v294_v53 = vmax.f32 %v245_v49, 0.0  ;;  %v207_v54 = vadd.f32 %v1081_v36, %v206_v52  ;;  %v560_v55 = vpop.f32.mrf.mxu1 }
  0xad   :  { %v648_v56 = vmax.f32 %v599_v51, 0.0  ;;  %v561_v57 = vadd.f32 %v1086_v37, %v560_v55 }
  0xae   :  { %v326_v58 = vpack.c.bf16 %v294_v53, %v294_v53  ;;  %v279_v59 = vmax.f32 %v207_v54, 0.0 }
  0xaf   :  { %v680_v60 = vpack.c.bf16 %v648_v56, %v648_v56  ;;  %v633_v61 = vmax.f32 %v561_v57, 0.0 }
  0xb0   :  { %359 = vst.msk [vmem:[%s1411_s3 + $0x50] sm:$0xf] %vm338_vm2, %v326_v58  ;;  %v311_v62 = vpack.c.bf16 %v279_v59, %v279_v59 }
  0xb1   :  { %712 = vst.msk [vmem:[%s1411_s3 + $0xd0] sm:$0xf] %vm338_vm2, %v680_v60  ;;  %v665_v63 = vpack.c.bf16 %v633_v61, %v633_v61  ;;  %v246_v0 = vpop.f32.mrf.mxu2 }
  0xb2   :  { %344 = vst.msk [vmem:[%s1411_s3 + $0x14] sm:$0xf] %vm338_vm2, %v311_v62  ;;  %v247_v1 = vadd.f32 %v1081_v36, %v246_v0  ;;  %v600_v2 = vpop.f32.mrf.mxu3 }
  0xb3   :  { %697 = vst.msk [vmem:[%s1411_s3 + $0x94] sm:$0xf] %vm338_vm2, %v665_v63  ;;  %v601_v3 = vadd.f32 %v1086_v37, %v600_v2  ;;  %v209_v4 = vpop.f32.mrf.mxu0 }
  0xb4   :  { %v295_v5 = vmax.f32 %v247_v1, 0.0  ;;  %v210_v6 = vadd.f32 %v1081_v36, %v209_v4  ;;  %v563_v7 = vpop.f32.mrf.mxu1 }
  0xb5   :  { %v649_v8 = vmax.f32 %v601_v3, 0.0  ;;  %v564_v9 = vadd.f32 %v1086_v37, %v563_v7 }
  0xb6   :  { %v327_v10 = vpack.c.bf16 %v295_v5, %v295_v5  ;;  %v280_v11 = vmax.f32 %v210_v6, 0.0 }
  0xb7   :  { %v681_v12 = vpack.c.bf16 %v649_v8, %v649_v8  ;;  %v634_v13 = vmax.f32 %v564_v9, 0.0 }
  0xb8   :  { %360 = vst.msk [vmem:[%s1411_s3 + $0x54] sm:$0xf] %vm338_vm2, %v327_v10  ;;  %v312_v14 = vpack.c.bf16 %v280_v11, %v280_v11 }
  0xb9   :  { %713 = vst.msk [vmem:[%s1411_s3 + $0xd4] sm:$0xf] %vm338_vm2, %v681_v12  ;;  %v666_v15 = vpack.c.bf16 %v634_v13, %v634_v13  ;;  %v249_v16 = vpop.f32.mrf.mxu2 }
  0xba   :  { %345 = vst.msk [vmem:[%s1411_s3 + $0x18] sm:$0xf] %vm338_vm2, %v312_v14  ;;  %v250_v17 = vadd.f32 %v1081_v36, %v249_v16  ;;  %v603_v18 = vpop.f32.mrf.mxu3 }
  0xbb   :  { %698 = vst.msk [vmem:[%s1411_s3 + $0x98] sm:$0xf] %vm338_vm2, %v666_v15  ;;  %v604_v19 = vadd.f32 %v1086_v37, %v603_v18  ;;  %v211_v20 = vpop.f32.mrf.mxu0 }
  0xbc   :  { %v296_v21 = vmax.f32 %v250_v17, 0.0  ;;  %v212_v22 = vadd.f32 %v1081_v36, %v211_v20  ;;  %v565_v23 = vpop.f32.mrf.mxu1 }
  0xbd   :  { %v650_v24 = vmax.f32 %v604_v19, 0.0  ;;  %v566_v25 = vadd.f32 %v1086_v37, %v565_v23 }
  0xbe   :  { %v328_v26 = vpack.c.bf16 %v296_v21, %v296_v21  ;;  %v281_v27 = vmax.f32 %v212_v22, 0.0 }
  0xbf   :  { %v682_v28 = vpack.c.bf16 %v650_v24, %v650_v24  ;;  %v635_v29 = vmax.f32 %v566_v25, 0.0 }
  0xc0   :  { %361 = vst.msk [vmem:[%s1411_s3 + $0x58] sm:$0xf] %vm338_vm2, %v328_v26  ;;  %v313_v30 = vpack.c.bf16 %v281_v27, %v281_v27 }
  0xc1   :  { %714 = vst.msk [vmem:[%s1411_s3 + $0xd8] sm:$0xf] %vm338_vm2, %v682_v28  ;;  %v667_v31 = vpack.c.bf16 %v635_v29, %v635_v29  ;;  %v251_v32 = vpop.f32.mrf.mxu2 }
  0xc2   :  { %346 = vst.msk [vmem:[%s1411_s3 + $0x1c] sm:$0xf] %vm338_vm2, %v313_v30  ;;  %v252_v33 = vadd.f32 %v1081_v36, %v251_v32  ;;  %v605_v34 = vpop.f32.mrf.mxu3 }
  0xc3   :  { %699 = vst.msk [vmem:[%s1411_s3 + $0x9c] sm:$0xf] %vm338_vm2, %v667_v31  ;;  %v606_v35 = vadd.f32 %v1086_v37, %v605_v34  ;;  %v214_v38 = vpop.f32.mrf.mxu0 }
  0xc4   :  { %v297_v39 = vmax.f32 %v252_v33, 0.0  ;;  %v215_v40 = vadd.f32 %v1081_v36, %v214_v38  ;;  %v568_v41 = vpop.f32.mrf.mxu1 }
  0xc5   :  { %v651_v42 = vmax.f32 %v606_v35, 0.0  ;;  %v569_v43 = vadd.f32 %v1086_v37, %v568_v41 }
  0xc6   :  { %v329_v44 = vpack.c.bf16 %v297_v39, %v297_v39  ;;  %v282_v45 = vmax.f32 %v215_v40, 0.0 }
  0xc7   :  { %v683_v46 = vpack.c.bf16 %v651_v42, %v651_v42  ;;  %v636_v47 = vmax.f32 %v569_v43, 0.0 }
  0xc8   :  { %362 = vst.msk [vmem:[%s1411_s3 + $0x5c] sm:$0xf] %vm338_vm2, %v329_v44  ;;  %v314_v48 = vpack.c.bf16 %v282_v45, %v282_v45 }
  0xc9   :  { %715 = vst.msk [vmem:[%s1411_s3 + $0xdc] sm:$0xf] %vm338_vm2, %v683_v46  ;;  %v668_v49 = vpack.c.bf16 %v636_v47, %v636_v47  ;;  %v254_v50 = vpop.f32.mrf.mxu2 }
  0xca   :  { %347 = vst.msk [vmem:[%s1411_s3 + $0x20] sm:$0xf] %vm338_vm2, %v314_v48  ;;  %v255_v51 = vadd.f32 %v1081_v36, %v254_v50  ;;  %v608_v52 = vpop.f32.mrf.mxu3 }
  0xcb   :  { %700 = vst.msk [vmem:[%s1411_s3 + $0xa0] sm:$0xf] %vm338_vm2, %v668_v49  ;;  %v609_v53 = vadd.f32 %v1086_v37, %v608_v52  ;;  %v216_v54 = vpop.f32.mrf.mxu0 }
  0xcc   :  { %v298_v55 = vmax.f32 %v255_v51, 0.0  ;;  %v217_v56 = vadd.f32 %v1081_v36, %v216_v54  ;;  %v570_v57 = vpop.f32.mrf.mxu1 }
  0xcd   :  { %v652_v58 = vmax.f32 %v609_v53, 0.0  ;;  %v571_v59 = vadd.f32 %v1086_v37, %v570_v57 }
  0xce   :  { %v330_v60 = vpack.c.bf16 %v298_v55, %v298_v55  ;;  %v283_v61 = vmax.f32 %v217_v56, 0.0 }
  0xcf   :  { %v684_v62 = vpack.c.bf16 %v652_v58, %v652_v58  ;;  %v637_v63 = vmax.f32 %v571_v59, 0.0 }
  0xd0   :  { %363 = vst.msk [vmem:[%s1411_s3 + $0x60] sm:$0xf] %vm338_vm2, %v330_v60  ;;  %v315_v0 = vpack.c.bf16 %v283_v61, %v283_v61 }
  0xd1   :  { %716 = vst.msk [vmem:[%s1411_s3 + $0xe0] sm:$0xf] %vm338_vm2, %v684_v62  ;;  %v669_v1 = vpack.c.bf16 %v637_v63, %v637_v63  ;;  %v256_v2 = vpop.f32.mrf.mxu2 }
  0xd2   :  { %348 = vst.msk [vmem:[%s1411_s3 + $0x24] sm:$0xf] %vm338_vm2, %v315_v0  ;;  %v257_v3 = vadd.f32 %v1081_v36, %v256_v2  ;;  %v610_v4 = vpop.f32.mrf.mxu3 }
  0xd3   :  { %701 = vst.msk [vmem:[%s1411_s3 + $0xa4] sm:$0xf] %vm338_vm2, %v669_v1  ;;  %v611_v5 = vadd.f32 %v1086_v37, %v610_v4  ;;  %v219_v6 = vpop.f32.mrf.mxu0 }
  0xd4   :  { %v299_v7 = vmax.f32 %v257_v3, 0.0  ;;  %v220_v8 = vadd.f32 %v1081_v36, %v219_v6  ;;  %v573_v9 = vpop.f32.mrf.mxu1 }
  0xd5   :  { %v653_v10 = vmax.f32 %v611_v5, 0.0  ;;  %v574_v11 = vadd.f32 %v1086_v37, %v573_v9 }
  0xd6   :  { %v331_v12 = vpack.c.bf16 %v299_v7, %v299_v7  ;;  %v284_v13 = vmax.f32 %v220_v8, 0.0 }
  0xd7   :  { %v685_v14 = vpack.c.bf16 %v653_v10, %v653_v10  ;;  %v638_v15 = vmax.f32 %v574_v11, 0.0 }
  0xd8   :  { %364 = vst.msk [vmem:[%s1411_s3 + $0x64] sm:$0xf] %vm338_vm2, %v331_v12  ;;  %v316_v16 = vpack.c.bf16 %v284_v13, %v284_v13 }
  0xd9   :  { %717 = vst.msk [vmem:[%s1411_s3 + $0xe4] sm:$0xf] %vm338_vm2, %v685_v14  ;;  %v670_v17 = vpack.c.bf16 %v638_v15, %v638_v15  ;;  %v259_v18 = vpop.f32.mrf.mxu2 }
  0xda   :  { %349 = vst.msk [vmem:[%s1411_s3 + $0x28] sm:$0xf] %vm338_vm2, %v316_v16  ;;  %v260_v19 = vadd.f32 %v1081_v36, %v259_v18  ;;  %v613_v20 = vpop.f32.mrf.mxu3 }
  0xdb   :  { %702 = vst.msk [vmem:[%s1411_s3 + $0xa8] sm:$0xf] %vm338_vm2, %v670_v17  ;;  %v614_v21 = vadd.f32 %v1086_v37, %v613_v20  ;;  %v221_v22 = vpop.f32.mrf.mxu0 }
  0xdc   :  { %v300_v23 = vmax.f32 %v260_v19, 0.0  ;;  %v222_v24 = vadd.f32 %v1081_v36, %v221_v22  ;;  %v575_v25 = vpop.f32.mrf.mxu1 }
  0xdd   :  { %v654_v26 = vmax.f32 %v614_v21, 0.0  ;;  %v576_v27 = vadd.f32 %v1086_v37, %v575_v25 }
  0xde   :  { %v332_v28 = vpack.c.bf16 %v300_v23, %v300_v23  ;;  %v285_v29 = vmax.f32 %v222_v24, 0.0 }
  0xdf   :  { %v686_v30 = vpack.c.bf16 %v654_v26, %v654_v26  ;;  %v639_v31 = vmax.f32 %v576_v27, 0.0 }
  0xe0   :  { %365 = vst.msk [vmem:[%s1411_s3 + $0x68] sm:$0xf] %vm338_vm2, %v332_v28  ;;  %v317_v32 = vpack.c.bf16 %v285_v29, %v285_v29 }
  0xe1   :  { %718 = vst.msk [vmem:[%s1411_s3 + $0xe8] sm:$0xf] %vm338_vm2, %v686_v30  ;;  %v671_v33 = vpack.c.bf16 %v639_v31, %v639_v31  ;;  %v261_v34 = vpop.f32.mrf.mxu2 }
  0xe2   :  { %350 = vst.msk [vmem:[%s1411_s3 + $0x2c] sm:$0xf] %vm338_vm2, %v317_v32  ;;  %v262_v35 = vadd.f32 %v1081_v36, %v261_v34  ;;  %v615_v38 = vpop.f32.mrf.mxu3 }
  0xe3   :  { %703 = vst.msk [vmem:[%s1411_s3 + $0xac] sm:$0xf] %vm338_vm2, %v671_v33  ;;  %v616_v39 = vadd.f32 %v1086_v37, %v615_v38  ;;  %v224_v40 = vpop.f32.mrf.mxu0 }
  0xe4   :  { %v301_v41 = vmax.f32 %v262_v35, 0.0  ;;  %v225_v42 = vadd.f32 %v1081_v36, %v224_v40  ;;  %v578_v43 = vpop.f32.mrf.mxu1 }
  0xe5   :  { %v655_v44 = vmax.f32 %v616_v39, 0.0  ;;  %v579_v45 = vadd.f32 %v1086_v37, %v578_v43 }
  0xe6   :  { %v333_v46 = vpack.c.bf16 %v301_v41, %v301_v41  ;;  %v286_v47 = vmax.f32 %v225_v42, 0.0 }
  0xe7   :  { %v687_v48 = vpack.c.bf16 %v655_v44, %v655_v44  ;;  %v640_v49 = vmax.f32 %v579_v45, 0.0 }
  0xe8   :  { %366 = vst.msk [vmem:[%s1411_s3 + $0x6c] sm:$0xf] %vm338_vm2, %v333_v46  ;;  %v318_v50 = vpack.c.bf16 %v286_v47, %v286_v47 }
  0xe9   :  { %719 = vst.msk [vmem:[%s1411_s3 + $0xec] sm:$0xf] %vm338_vm2, %v687_v48  ;;  %v672_v51 = vpack.c.bf16 %v640_v49, %v640_v49  ;;  %v264_v52 = vpop.f32.mrf.mxu2 }
  0xea   :  { %351 = vst.msk [vmem:[%s1411_s3 + $0x30] sm:$0xf] %vm338_vm2, %v318_v50  ;;  %v265_v53 = vadd.f32 %v1081_v36, %v264_v52  ;;  %v618_v54 = vpop.f32.mrf.mxu3 }
  0xeb   :  { %704 = vst.msk [vmem:[%s1411_s3 + $0xb0] sm:$0xf] %vm338_vm2, %v672_v51  ;;  %v619_v55 = vadd.f32 %v1086_v37, %v618_v54  ;;  %v226_v56 = vpop.f32.mrf.mxu0 }
  0xec   :  { %v302_v57 = vmax.f32 %v265_v53, 0.0  ;;  %v227_v58 = vadd.f32 %v1081_v36, %v226_v56  ;;  %v580_v59 = vpop.f32.mrf.mxu1 }
  0xed   :  { %v656_v60 = vmax.f32 %v619_v55, 0.0  ;;  %v581_v61 = vadd.f32 %v1086_v37, %v580_v59 }
  0xee   :  { %v334_v62 = vpack.c.bf16 %v302_v57, %v302_v57  ;;  %v287_v63 = vmax.f32 %v227_v58, 0.0 }
  0xef   :  { %v688_v0 = vpack.c.bf16 %v656_v60, %v656_v60  ;;  %v641_v1 = vmax.f32 %v581_v61, 0.0 }
  0xf0   :  { %367 = vst.msk [vmem:[%s1411_s3 + $0x70] sm:$0xf] %vm338_vm2, %v334_v62  ;;  %v319_v2 = vpack.c.bf16 %v287_v63, %v287_v63 }
  0xf1   :  { %720 = vst.msk [vmem:[%s1411_s3 + $0xf0] sm:$0xf] %vm338_vm2, %v688_v0  ;;  %v673_v3 = vpack.c.bf16 %v641_v1, %v641_v1  ;;  %v266_v4 = vpop.f32.mrf.mxu2 }
  0xf2   :  { %352 = vst.msk [vmem:[%s1411_s3 + $0x34] sm:$0xf] %vm338_vm2, %v319_v2  ;;  %v267_v5 = vadd.f32 %v1081_v36, %v266_v4  ;;  %v620_v6 = vpop.f32.mrf.mxu3 }
  0xf3   :  { %705 = vst.msk [vmem:[%s1411_s3 + $0xb4] sm:$0xf] %vm338_vm2, %v673_v3  ;;  %v621_v7 = vadd.f32 %v1086_v37, %v620_v6  ;;  %v229_v8 = vpop.f32.mrf.mxu0 }
  0xf4   :  { %v303_v9 = vmax.f32 %v267_v5, 0.0  ;;  %v230_v10 = vadd.f32 %v1081_v36, %v229_v8  ;;  %v583_v11 = vpop.f32.mrf.mxu1 }
  0xf5   :  { %v657_v12 = vmax.f32 %v621_v7, 0.0  ;;  %v584_v13 = vadd.f32 %v1086_v37, %v583_v11 }
  0xf6   :  { %v335_v14 = vpack.c.bf16 %v303_v9, %v303_v9  ;;  %v288_v15 = vmax.f32 %v230_v10, 0.0 }
  0xf7   :  { %v689_v16 = vpack.c.bf16 %v657_v12, %v657_v12  ;;  %v642_v17 = vmax.f32 %v584_v13, 0.0 }
  0xf8   :  { %368 = vst.msk [vmem:[%s1411_s3 + $0x74] sm:$0xf] %vm338_vm2, %v335_v14  ;;  %v320_v18 = vpack.c.bf16 %v288_v15, %v288_v15 }
  0xf9   :  { %721 = vst.msk [vmem:[%s1411_s3 + $0xf4] sm:$0xf] %vm338_vm2, %v689_v16  ;;  %v674_v19 = vpack.c.bf16 %v642_v17, %v642_v17  ;;  %v269_v20 = vpop.f32.mrf.mxu2 }
  0xfa   :  { %353 = vst.msk [vmem:[%s1411_s3 + $0x38] sm:$0xf] %vm338_vm2, %v320_v18  ;;  %v270_v21 = vadd.f32 %v1081_v36, %v269_v20  ;;  %v623_v22 = vpop.f32.mrf.mxu3 }
  0xfb   :  { %706 = vst.msk [vmem:[%s1411_s3 + $0xb8] sm:$0xf] %vm338_vm2, %v674_v19  ;;  %v624_v23 = vadd.f32 %v1086_v37, %v623_v22  ;;  %v231_v24 = vpop.f32.mrf.mxu0 }
  0xfc   :  { %v304_v25 = vmax.f32 %v270_v21, 0.0  ;;  %v232_v26 = vadd.f32 %v1081_v36, %v231_v24  ;;  %v585_v27 = vpop.f32.mrf.mxu1 }
  0xfd   :  { %v658_v28 = vmax.f32 %v624_v23, 0.0  ;;  %v586_v29 = vadd.f32 %v1086_v37, %v585_v27 }
  0xfe   :  { %v336_v30 = vpack.c.bf16 %v304_v25, %v304_v25  ;;  %v289_v31 = vmax.f32 %v232_v26, 0.0 }
  0xff   :  { %v690_v32 = vpack.c.bf16 %v658_v28, %v658_v28  ;;  %v643_v33 = vmax.f32 %v586_v29, 0.0 }
 0x100   :  { %369 = vst.msk [vmem:[%s1411_s3 + $0x78] sm:$0xf] %vm338_vm2, %v336_v30  ;;  %v321_v34 = vpack.c.bf16 %v289_v31, %v289_v31 }
 0x101   :  { %722 = vst.msk [vmem:[%s1411_s3 + $0xf8] sm:$0xf] %vm338_vm2, %v690_v32  ;;  %v675_v35 = vpack.c.bf16 %v643_v33, %v643_v33  ;;  %v271_v38 = vpop.f32.mrf.mxu2 }
 0x102   :  { %354 = vst.msk [vmem:[%s1411_s3 + $0x3c] sm:$0xf] %vm338_vm2, %v321_v34  ;;  %v272_v39 = vadd.f32 %v1081_v36, %v271_v38  ;;  %v625_v40 = vpop.f32.mrf.mxu3 }
 0x103   :  { %707 = vst.msk [vmem:[%s1411_s3 + $0xbc] sm:$0xf] %vm338_vm2, %v675_v35  ;;  %v626_v41 = vadd.f32 %v1086_v37, %v625_v40 }
 0x104   :  { %v305_v42 = vmax.f32 %v272_v39, 0.0 }
 0x105   :  { %v659_v43 = vmax.f32 %v626_v41, 0.0 }
 0x106   :  { %v337_v44 = vpack.c.bf16 %v305_v42, %v305_v42 }
 0x107   :  { %v691_v45 = vpack.c.bf16 %v659_v43, %v659_v43 }
 0x108   :  { %370 = vst.msk [vmem:[%s1411_s3 + $0x7c] sm:$0xf] %vm338_vm2, %v337_v44 }
 0x109   :  { %723 = vst.msk [vmem:[%s1411_s3 + $0xfc] sm:$0xf] %vm338_vm2, %v691_v45 }

</bundles_post_ra>
